<compile_context>
chip_gen: v7x
topology: tpu7x:2x2x1
jax: 0.10.0
libtpu: 0.0.40
codegen_flags: <defaults>
</compile_context>

<pallas_src>
import functools
import math
from typing import NamedTuple

import jax
import jax.numpy as jnp
from jax.experimental import pallas as pl
from jax.experimental.pallas import tpu as pltpu


_LANE = 128     # last-dim alignment (vreg lanes / MXU N,K)
_SUBLANE = 8    # second-to-last-dim alignment (vreg sublanes)


def _round_up(x, m):
    return ((x + m - 1) // m) * m


def _vmem_capacity_bytes():
    """Physical VMEM per TensorCore (64 MiB on v7x, 128 MiB on v5e/v6e)."""
    try:
        return int(pltpu.get_tpu_info().vmem_capacity_bytes)
    except Exception:
        return 64 << 20   # conservative default: v7x per-TC capacity


# ---------------------------------------------------------------------------
# Activations (mirrors ANN.get_activation).  All are elementwise VPU/EUP ops
# computed in f32 inside the kernel, and every one maps 0 -> 0 so feature-dim
# zero-padding is exact.
# ---------------------------------------------------------------------------
def _erf(x):
    # Abramowitz & Stegun 7.1.26 (max abs err ~1.5e-7, i.e. f32 noise level):
    # exact-GELU numerics using only ops Mosaic lowers natively (exp + VPU math).
    a1, a2, a3, a4, a5 = (0.254829592, -0.284496736, 1.421413741,
                          -1.453152027, 1.061405429)
    p = 0.3275911
    z = jnp.maximum(x, -x)
    t = 1.0 / (1.0 + p * z)
    poly = ((((a5 * t + a4) * t + a3) * t + a2) * t + a1) * t
    e = 1.0 - poly * jnp.exp(-z * z)
    return jnp.where(x >= 0, e, -e)


def _make_activation(name, *, prelu_alpha=0.25, approximate_gelu=False):
    if name == "relu":
        return lambda x: jnp.maximum(x, 0.0)
    if name == "leaky_relu":
        return lambda x: jnp.where(x >= 0, x, 0.01 * x)           # nn.LeakyReLU default
    if name == "ELU":
        return lambda x: jnp.where(x > 0, x, jnp.exp(x) - 1.0)    # alpha = 1.0
    if name == "PReLU":
        # nn.PReLU at its init value (0.25).
        # TODO(synk): accept a learned (possibly per-channel) PReLU weight.
        return lambda x: jnp.where(x >= 0, x, prelu_alpha * x)
    if name == "SELU":
        alpha = 1.6732632423543772
        scale = 1.0507009873554805
        return lambda x: scale * jnp.where(x > 0, x, alpha * (jnp.exp(x) - 1.0))
    if name == "GELU":
        if approximate_gelu:
            # Opt-in tanh approximation: runs on the (otherwise idle) EUP slot
            # instead of a long VPU polynomial; numerics differ slightly from
            # PyTorch's default exact GELU.
            c = 0.7978845608028654
            return lambda x: 0.5 * x * (1.0 + jnp.tanh(c * (x + 0.044715 * x * x * x)))
        return lambda x: 0.5 * x * (1.0 + _erf(x * 0.7071067811865476))
    return lambda x: x    # nn.Identity


# ---------------------------------------------------------------------------
# Kernels
# ---------------------------------------------------------------------------
def _ann_kernel_resident(x_ref, w1_ref, b1_ref, w2_ref, b2_ref, o_ref, *,
                         hidden_act, output_act):
    # Weights fully resident in VMEM: two MXU matmuls (native-dtype operands,
    # f32 accumulation); activations + bias adds in f32 on the VPU/EUP.
    h = jnp.dot(x_ref[...], w1_ref[...], preferred_element_type=jnp.float32)
    h = hidden_act(h + b1_ref[...])
    y = jnp.dot(h.astype(w2_ref.dtype), w2_ref[...],
                preferred_element_type=jnp.float32)
    o_ref[...] = output_act(y + b2_ref[...]).astype(o_ref.dtype)


def _ann_kernel_htiled(x_ref, w1_ref, b1_ref, w2_ref, b2_ref, o_ref, acc_ref, *,
                       hidden_act, output_act):
    # Hidden dim tiled across grid axis 1 (weights too large to sit resident,
    # e.g. v7x's 64 MiB VMEM): per-chunk fc1 + act, accumulate fc2 partials
    # into an f32 VMEM scratch, finalize with bias + output activation.
    c = pl.program_id(1)

    @pl.when(c == 0)
    def _():
        acc_ref[...] = jnp.zeros_like(acc_ref)

    h = jnp.dot(x_ref[...], w1_ref[...], preferred_element_type=jnp.float32)
    h = hidden_act(h + b1_ref[...])
    acc_ref[...] += jnp.dot(h.astype(w2_ref.dtype), w2_ref[...],
                            preferred_element_type=jnp.float32)

    @pl.when(c == pl.num_programs(1) - 1)
    def _():
        o_ref[...] = output_act(acc_ref[...] + b2_ref[...]).astype(o_ref.dtype)


# ---------------------------------------------------------------------------
# Parameter preparation (hoisted out of the per-call hot path)
# ---------------------------------------------------------------------------
class PreparedParams(NamedTuple):
    w1: jax.Array      # [I_p, H_p], compute dtype
    b1: jax.Array      # [1,  H_p], f32
    w2: jax.Array      # [H_p, O_p], compute dtype
    b2: jax.Array      # [1,  O_p], f32
    dims: tuple        # logical (I, H, O)


def prepare_params(w1, b1, w2, b2, *, compute_dtype=None):
    """Pad/cast parameters ONCE.  w1: [I,H], b1: [H], w2: [H,O], b2: [O]
    (already transposed from PyTorch's [out, in] layout).  Feature dims are
    zero-padded to 128 lanes for dense stores and full MXU tiles; padding is
    exact because padded weight rows/cols are zero and act(0) == 0."""
    I, H = w1.shape
    H2, O = w2.shape
    assert H2 == H and b1.shape == (H,) and b2.shape == (O,)
    if compute_dtype is None:
        # bf16 MXU operands by default for f32 params (accumulation stays f32):
        # the MXU is bf16-native on v5e/v6e/v7x; f32 operands are multi-pass.
        compute_dtype = jnp.bfloat16 if w1.dtype == jnp.float32 else w1.dtype
    I_p, H_p, O_p = (_round_up(d, _LANE) for d in (I, H, O))
    w1_p = jnp.zeros((I_p, H_p), compute_dtype).at[:I, :H].set(w1.astype(compute_dtype))
    w2_p = jnp.zeros((H_p, O_p), compute_dtype).at[:H, :O].set(w2.astype(compute_dtype))
    b1_p = jnp.zeros((1, H_p), jnp.float32).at[0, :H].set(b1.astype(jnp.float32))
    b2_p = jnp.zeros((1, O_p), jnp.float32).at[0, :O].set(b2.astype(jnp.float32))
    return PreparedParams(w1_p, b1_p, w2_p, b2_p, (I, H, O))


def _pick_block_h(H_p, fits):
    """Largest 128-multiple divisor of H_p that fits the VMEM budget (exact
    division is required: the H axis is a contraction for fc2)."""
    k = H_p // _LANE
    divs = sorted({d for i in range(1, int(math.isqrt(k)) + 1) if k % i == 0
                   for d in (i, k // i)}, reverse=True)
    for d in divs:
        if fits(d * _LANE):
            return d * _LANE
    return _LANE


# ---------------------------------------------------------------------------
# Forward pass
# ---------------------------------------------------------------------------
def ann_forward_prepared(x, params, *, hidden_activation, output_activation,
                         block_batch=None, block_h=None, prelu_alpha=0.25,
                         approximate_gelu=False):
    """x: [B, I] -> [B, O] through the fused two-layer kernel."""
    B, I = x.shape
    I_l, H, O = params.dims
    assert I == I_l, f"expected input_size={I_l}, got {I}"
    compute_dtype = params.w1.dtype
    out_dtype = x.dtype
    I_p, H_p = params.w1.shape
    O_p = params.w2.shape[1]

    # --- batch tiling --------------------------------------------------------
    # Pad the batch only to a sublane multiple; ragged last tiles are handled
    # by masked reads/writes (rows are independent, so no contamination).
    B_p = _round_up(B, _SUBLANE)
    if block_batch is None:
        if B_p <= _SUBLANE:
            block_batch = B_p
        else:
            # >= 2 'parallel' grid steps so both v7x TensorCores get work;
            # cap at 512 rows (v6e HBM-streaming sweet spot).
            block_batch = min(512, _round_up(pl.cdiv(B_p, 2), _SUBLANE))
    else:
        block_batch = max(_SUBLANE, min(_round_up(block_batch, _SUBLANE), B_p))

    if B == B_p and I == I_p and x.dtype == compute_dtype:
        x_p = x                                   # already aligned: zero-copy
    else:
        x_p = jnp.zeros((B_p, I_p), compute_dtype).at[:B, :I].set(
            x.astype(compute_dtype))

    # --- VMEM budgeting / hidden-dim tiling -----------------------------------
    wt_b = params.w1.dtype.itemsize
    out_b = out_dtype.itemsize
    vmem_cap = _vmem_capacity_bytes()
    budget = vmem_cap - (16 << 20)        # headroom for Mosaic internal scratch

    def footprint(bb, bh):
        # Worst case: double-buffered weight/bias blocks + double-buffered
        # x/out stream + live f32 intermediates and accumulator.
        weights = 2 * ((I_p * bh + bh * O_p) * wt_b + (bh + O_p) * 4)
        stream = 2 * bb * (I_p * wt_b + O_p * out_b)
        live = bb * (bh + 2 * O_p) * 4
        return weights + stream + live

    # If even the smallest H tile would not fit, shrink the batch tile first.
    while block_batch > _SUBLANE and footprint(block_batch, _LANE) > budget:
        block_batch = _round_up(block_batch // 2, _SUBLANE)
    grid_b = pl.cdiv(B_p, block_batch)

    if block_h is not None:
        block_h = min(_round_up(block_h, _LANE), H_p)
        while H_p % block_h:                  # snap to an exact divisor of H_p
            block_h -= _LANE
    elif footprint(block_batch, H_p) <= budget:
        block_h = H_p                         # weights fully resident
    else:
        block_h = _pick_block_h(H_p, lambda bh: footprint(block_batch, bh) <= budget)
    grid_h = H_p // block_h
    # TODO(synk): also tile the input dim (I) when the x tile / W1 rows still
    # exceed VMEM after H tiling (needs a second accumulation stage).

    vmem_limit = int(min(max(32 << 20, footprint(block_batch, block_h) + (8 << 20)),
                         vmem_cap - (8 << 20)))

    hidden_act = _make_activation(hidden_activation, prelu_alpha=prelu_alpha,
                                  approximate_gelu=approximate_gelu)
    output_act = _make_activation(output_activation, prelu_alpha=prelu_alpha,
                                  approximate_gelu=approximate_gelu)

    if grid_h == 1:
        kernel = functools.partial(_ann_kernel_resident,
                                   hidden_act=hidden_act, output_act=output_act)
        grid = (grid_b,)
        in_specs = [
            pl.BlockSpec((block_batch, I_p), lambda i: (i, 0)),   # x (streamed)
            pl.BlockSpec((I_p, H_p), lambda i: (0, 0)),           # w1 (resident)
            pl.BlockSpec((1, H_p), lambda i: (0, 0)),             # b1
            pl.BlockSpec((H_p, O_p), lambda i: (0, 0)),           # w2 (resident)
            pl.BlockSpec((1, O_p), lambda i: (0, 0)),             # b2
        ]
        out_specs = pl.BlockSpec((block_batch, O_p), lambda i: (i, 0))
        scratch = []
        dims = ("parallel",)
    else:
        kernel = functools.partial(_ann_kernel_htiled,
                                   hidden_act=hidden_act, output_act=output_act)
        grid = (grid_b, grid_h)                 # reduction (H) axis innermost
        in_specs = [
            pl.BlockSpec((block_batch, I_p), lambda i, c: (i, 0)),
            pl.BlockSpec((I_p, block_h), lambda i, c: (0, c)),
            pl.BlockSpec((1, block_h), lambda i, c: (0, c)),
            pl.BlockSpec((block_h, O_p), lambda i, c: (c, 0)),
            pl.BlockSpec((1, O_p), lambda i, c: (0, 0)),
        ]
        out_specs = pl.BlockSpec((block_batch, O_p), lambda i, c: (i, 0))
        scratch = [pltpu.VMEM((block_batch, O_p), jnp.float32)]
        dims = ("parallel", "arbitrary")

    out_p = pl.pallas_call(
        kernel,
        out_shape=jax.ShapeDtypeStruct((B_p, O_p), out_dtype),
        grid_spec=pltpu.PrefetchScalarGridSpec(
            num_scalar_prefetch=0,
            grid=grid,
            in_specs=in_specs,
            out_specs=out_specs,
            scratch_shapes=scratch,
        ),
        compiler_params=pltpu.CompilerParams(
            dimension_semantics=dims,
            vmem_limit_bytes=vmem_limit,
        ),
    )(x_p, params.w1, params.b1, params.w2, params.b2)

    if B_p == B and O_p == O:
        return out_p
    return out_p[:B, :O]


def ann_forward(x, w1, b1, w2, b2, *, hidden_activation, output_activation,
                compute_dtype=None, **kwargs):
    """One-shot convenience wrapper.  For repeated inference, call
    prepare_params once and reuse it with ann_forward_prepared."""
    params = prepare_params(w1, b1, w2, b2, compute_dtype=compute_dtype)
    return ann_forward_prepared(x, params, hidden_activation=hidden_activation,
                                output_activation=output_activation, **kwargs)


# ---------------------------------------------------------------------------
# Deterministic init (nn.Linear convention; PyTorch stores weight as [out, in],
# transposed once here to [in, out]) and a pure-JAX reference.
# ---------------------------------------------------------------------------
def init_params(key, input_size, hidden_size, output_size):
    k1, k2, k3, k4 = jax.random.split(key, 4)
    bound1 = 1.0 / math.sqrt(input_size)
    bound2 = 1.0 / math.sqrt(hidden_size)
    w1_pt = jax.random.uniform(k1, (hidden_size, input_size), jnp.float32, -bound1, bound1)
    b1 = jax.random.uniform(k2, (hidden_size,), jnp.float32, -bound1, bound1)
    w2_pt = jax.random.uniform(k3, (output_size, hidden_size), jnp.float32, -bound2, bound2)
    b2 = jax.random.uniform(k4, (output_size,), jnp.float32, -bound2, bound2)
    return w1_pt.T, b1, w2_pt.T, b2


def _reference(x, w1, b1, w2, b2, hidden_activation, output_activation):
    ha = _make_activation(hidden_activation)
    oa = _make_activation(output_activation)
    hi = jnp.dot(x, w1, precision=jax.lax.Precision.HIGHEST) + b1[None, :]
    h = ha(hi)
    return oa(jnp.dot(h, w2, precision=jax.lax.Precision.HIGHEST) + b2[None, :])


if __name__ == "__main__":
    key = jax.random.PRNGKey(0)
    kx1, kp1, kx2, kp2, kx3, kp3 = jax.random.split(key, 6)

    # Case 1: f32 compute path, relu / identity, aligned batch.  Tight check,
    # prepared params reused across two calls (padding hoisted out of hot path).
    B, I, H, O = 8, 16, 32, 4
    x = jax.random.normal(kx1, (B, I), jnp.float32)
    w1, b1, w2, b2 = init_params(kp1, I, H, O)
    params_f32 = prepare_params(w1, b1, w2, b2, compute_dtype=jnp.float32)
    out = jax.block_until_ready(ann_forward_prepared(
        x, params_f32, hidden_activation="relu", output_activation="identity"))
    ref = _reference(x, w1, b1, w2, b2, "relu", "identity")
    assert out.shape == (B, O)
    assert jnp.allclose(out, ref, atol=1e-4, rtol=1e-4), "case1 mismatch"

    out_b = jax.block_until_ready(ann_forward_prepared(
        2.0 * x, params_f32, hidden_activation="relu", output_activation="identity"))
    ref_b = _reference(2.0 * x, w1, b1, w2, b2, "relu", "identity")
    assert jnp.allclose(out_b, ref_b, atol=1e-4, rtol=1e-4), "case1b mismatch"

    # Case 2: default bf16 MXU operands (f32 accumulation), ragged batch,
    # transcendental activations (GELU / SELU).
    B2 = 10
    x2 = jax.random.normal(kx2, (B2, I), jnp.float32)
    w1b, b1b, w2b, b2b = init_params(kp2, I, H, O)
    out2 = jax.block_until_ready(ann_forward(
        x2, w1b, b1b, w2b, b2b,
        hidden_activation="GELU", output_activation="SELU"))
    ref2 = _reference(x2, w1b, b1b, w2b, b2b, "GELU", "SELU")
    assert out2.shape == (B2, O)
    assert jnp.allclose(out2, ref2, atol=5e-2, rtol=5e-2), "case2 mismatch"

    # Case 3: forced hidden-dim-tiled path (f32 accumulator + pl.when
    # init/finalize), f32 compute for a tight check.
    B3, H3 = 16, 256
    x3 = jax.random.normal(kx3, (B3, I), jnp.float32)
    w1c, b1c, w2c, b2c = init_params(kp3, I, H3, O)
    out3 = jax.block_until_ready(ann_forward(
        x3, w1c, b1c, w2c, b2c, compute_dtype=jnp.float32,
        hidden_activation="leaky_relu", output_activation="ELU", block_h=128))
    ref3 = _reference(x3, w1c, b1c, w2c, b2c, "leaky_relu", "ELU")
    assert out3.shape == (B3, O)
    assert jnp.allclose(out3, ref3, atol=1e-4, rtol=1e-4), "case3 mismatch"

    print("KERNEL_OK")
</pallas_src>

<mosaic_0001>
module attributes {stable_mosaic.version = 11 : i64} {
  func.func @_ann_kernel_resident(%arg0: i32, %arg1: memref<8x128xf32, #tpu.memory_space<vmem>>, %arg2: memref<128x128xf32, #tpu.memory_space<vmem>>, %arg3: memref<1x128xf32, #tpu.memory_space<vmem>>, %arg4: memref<128x128xf32, #tpu.memory_space<vmem>>, %arg5: memref<1x128xf32, #tpu.memory_space<vmem>>, %arg6: memref<8x128xf32, #tpu.memory_space<vmem>>) attributes {dimension_semantics = [#tpu.dimension_semantics<parallel>], iteration_bounds = array<i64: 1>, scalar_prefetch = 0 : i64, scratch_operands = 0 : i64, tpu.core_type = #tpu.core_type<tc>, window_params = [{transform_indices = @transform_0, window_bounds = array<i64: 8, 128>}, {pipeline_mode = #tpu.pipeline_mode<synchronous>, transform_indices = @transform_1, window_bounds = array<i64: 128, 128>}, {pipeline_mode = #tpu.pipeline_mode<synchronous>, transform_indices = @transform_2, window_bounds = array<i64: 1, 128>}, {pipeline_mode = #tpu.pipeline_mode<synchronous>, transform_indices = @transform_3, window_bounds = array<i64: 128, 128>}, {pipeline_mode = #tpu.pipeline_mode<synchronous>, transform_indices = @transform_4, window_bounds = array<i64: 1, 128>}, {transform_indices = @transform_5, window_bounds = array<i64: 8, 128>}]} {
    %c0 = arith.constant 0 : index
    %c0_0 = arith.constant 0 : index
    %0 = vector.load %arg1[%c0, %c0_0] : memref<8x128xf32, #tpu.memory_space<vmem>>, vector<8x128xf32>
    %c0_1 = arith.constant 0 : index
    %c0_2 = arith.constant 0 : index
    %1 = vector.load %arg2[%c0_1, %c0_2] : memref<128x128xf32, #tpu.memory_space<vmem>>, vector<128x128xf32>
    %cst = arith.constant dense<0.000000e+00> : vector<8x128xf32>
    %2 = tpu.matmul %0, %1, %cst {dimension_numbers = #tpu.dot_dimension_numbers<[1], [0], [0], [1], [0, 0, 1, 1], [], []>} : vector<8x128xf32>, vector<128x128xf32>, vector<8x128xf32> -> vector<8x128xf32>
    %c0_3 = arith.constant 0 : index
    %c0_4 = arith.constant 0 : index
    %3 = vector.load %arg3[%c0_3, %c0_4] : memref<1x128xf32, #tpu.memory_space<vmem>>, vector<1x128xf32>
    %4 = vector.broadcast %3 : vector<1x128xf32> to vector<8x128xf32>
    %5 = arith.addf %2, %4 : vector<8x128xf32>
    %cst_5 = arith.constant 0.000000e+00 : f32
    %6 = vector.broadcast %cst_5 : f32 to vector<8x128xf32>
    %7 = arith.maximumf %5, %6 : vector<8x128xf32>
    %c0_6 = arith.constant 0 : index
    %c0_7 = arith.constant 0 : index
    %8 = vector.load %arg4[%c0_6, %c0_7] : memref<128x128xf32, #tpu.memory_space<vmem>>, vector<128x128xf32>
    %cst_8 = arith.constant dense<0.000000e+00> : vector<8x128xf32>
    %9 = tpu.matmul %7, %8, %cst_8 {dimension_numbers = #tpu.dot_dimension_numbers<[1], [0], [0], [1], [0, 0, 1, 1], [], []>} : vector<8x128xf32>, vector<128x128xf32>, vector<8x128xf32> -> vector<8x128xf32>
    %c0_9 = arith.constant 0 : index
    %c0_10 = arith.constant 0 : index
    %10 = vector.load %arg5[%c0_9, %c0_10] : memref<1x128xf32, #tpu.memory_space<vmem>>, vector<1x128xf32>
    %11 = vector.broadcast %10 : vector<1x128xf32> to vector<8x128xf32>
    %12 = arith.addf %9, %11 : vector<8x128xf32>
    %c0_11 = arith.constant 0 : index
    %c0_12 = arith.constant 0 : index
    %13 = vector.load %arg6[%c0_11, %c0_12] : memref<8x128xf32, #tpu.memory_space<vmem>>, vector<8x128xf32>
    tpu.vector_store %arg6[%c0_11, %c0_12], %12 {strides = array<i32>} : memref<8x128xf32, #tpu.memory_space<vmem>>, vector<8x128xf32>,
    return
  }
  func.func @transform_0(%arg0: i32) -> (i32, i32) {
    %c0_i32 = arith.constant 0 : i32
    %c0_i32_0 = arith.constant 0 : i32
    return %arg0, %c0_i32 : i32, i32
  }
  func.func @transform_1(%arg0: i32) -> (i32, i32) {
    %c0_i32 = arith.constant 0 : i32
    %c0_i32_0 = arith.constant 0 : i32
    %c0_i32_1 = arith.constant 0 : i32
    return %c0_i32, %c0_i32_0 : i32, i32
  }
  func.func @transform_2(%arg0: i32) -> (i32, i32) {
    %c0_i32 = arith.constant 0 : i32
    %c0_i32_0 = arith.constant 0 : i32
    %c0_i32_1 = arith.constant 0 : i32
    return %c0_i32, %c0_i32_0 : i32, i32
  }
  func.func @transform_3(%arg0: i32) -> (i32, i32) {
    %c0_i32 = arith.constant 0 : i32
    %c0_i32_0 = arith.constant 0 : i32
    %c0_i32_1 = arith.constant 0 : i32
    return %c0_i32, %c0_i32_0 : i32, i32
  }
  func.func @transform_4(%arg0: i32) -> (i32, i32) {
    %c0_i32 = arith.constant 0 : i32
    %c0_i32_0 = arith.constant 0 : i32
    %c0_i32_1 = arith.constant 0 : i32
    return %c0_i32, %c0_i32_0 : i32, i32
  }
  func.func @transform_5(%arg0: i32) -> (i32, i32) {
    %c0_i32 = arith.constant 0 : i32
    %c0_i32_0 = arith.constant 0 : i32
    return %arg0, %c0_i32 : i32, i32
  }
}

</mosaic_0001>

<bundles_post_ra>
// kernel: tpu_custom_call.1
= control target key start
LH: loop header
LB: loop body
LE: loop exit
PB: predicated region body
PF: predicated region fallthrough
CT: control target
= control target key end

     0   :  { %10 = vsyncpa [#allocation3], 0  ;;  %s637_s0 = inlined_call_operand.hbm [shape: f32[8,128], index: 0, kind: input, shape index: {}]   ;;  %s638_s1 = inlined_call_operand.hbm [shape: f32[128,128], index: 1, kind: input, shape index: {}]   ;;  %s639_s2 = inlined_call_operand.vmem [shape: f32[1,128], index: 2, kind: input, shape index: {}]   ;;  %s640_s3 = inlined_call_operand.hbm [shape: f32[128,128], index: 3, kind: input, shape index: {}]   ;;  %s641_s4 = inlined_call_operand.vmem [shape: f32[1,128], index: 4, kind: input, shape index: {}]   ;;  %s642_s5 = inlined_call_operand.hbm [shape: f32[8,128], index: 5, kind: output, shape index: {}]  }
   0x1   :  { %11 = vsyncpa [#allocation6], 0 }
   0x2   :  { %12 = vsyncpa [#allocation4], 0  ;;  %s522_s18 = smov [#allocation5]   ;;  %s428_s22 = scalar_lea.hbm %s638_s1, 2048 }
   0x3   :  { %s28_s19 = sshll.u32 %s522_s18, 4  ;;  %p429_p0 = scmp.ne.s32.totalorder %s638_s1, %s428_s22  ;;  %s29_s19 = int_to_ptr.vmem [resolvable:$true] %s28_s19 }
   0x4   :  { %p432_p1 = scmp.lt.u32.totalorder %s428_s22, %s638_s1 }
   0x6   :  { %p434_p2 = pnand %p432_p1, %p429_p0 }
   0x8   :  { %437 = shalt.err (!%p434_p2)
}
   0x9   :  { %s438_s27 = scalar_lea.vmem %s29_s19, 2048  ;;  %p443_p4 = scmp.lt.s32.totalorder %s29_s19, %s29_s19 }
   0xa   :  { %p439_p3 = scmp.ne.s32.totalorder %s29_s19, %s438_s27  ;;  %p444_p5 = scmp.lt.s32.totalorder %s438_s27, %s438_s27 }
   0xc   :  { %p445_p6 = por %p444_p5, %p443_p4 }
   0xe   :  { %p446_p7 = pnand %p445_p6, %p439_p3 }
  0x10   :  { %449 = shalt.err (!%p446_p7)
}
  0x11   :  { %s523_s28 = smov 128   ;;  %s524_s29 = smov 8  }
  0x12   :  { %34 = dma.hbm_to_vmem [thread:$0]  %s638_s1, 2048, %s29_s19, [#allocation6], %s523_s28, %s523_s28, %s524_s29  }
  0x13   :  { %s525_s7 = smov [#allocation2]   ;;  %s526_s9 = smov [#allocation7]  }
  0x14   :  { %s19_s8 = sshll.u32 %s525_s7, 4  ;;  %s42_s10 = sshll.u32 %s526_s9, 4  ;;  %s20_s8 = int_to_ptr.vmem [resolvable:$true] %s19_s8  ;;  %s43_s10 = int_to_ptr.vmem [resolvable:$true] %s42_s10 }
  0x15   :  { %s450_s13 = scalar_lea.hbm %s637_s0, 128 }
  0x16   :  { %p451_p8 = scmp.ne.s32.totalorder %s637_s0, %s450_s13  ;;  %p454_p9 = scmp.lt.u32.totalorder %s450_s13, %s637_s0 }
  0x18   :  { %p456_p10 = pnand %p454_p9, %p451_p8 }
  0x1a   :  { %459 = shalt.err (!%p456_p10)
}
  0x1b   :  { %s460_s1 = scalar_lea.vmem %s20_s8, 128  ;;  %p465_p12 = scmp.lt.s32.totalorder %s20_s8, %s20_s8 }
  0x1c   :  { %p461_p11 = scmp.ne.s32.totalorder %s20_s8, %s460_s1  ;;  %p466_p13 = scmp.lt.s32.totalorder %s460_s1, %s460_s1 }
  0x1e   :  { %p467_p0 = por %p466_p13, %p465_p12 }
  0x20   :  { %p468_p1 = pnand %p467_p0, %p461_p11 }
  0x22   :  { %471 = shalt.err (!%p468_p1)
}
  0x23   :  { %22 = dma.hbm_to_vmem [thread:$0]  %s637_s0, 128, %s20_s8, [#allocation3]  }
  0x24   :  { %s472_s22 = scalar_lea.hbm %s640_s3, 2048 }
  0x25   :  { %p473_p2 = scmp.ne.s32.totalorder %s640_s3, %s472_s22  ;;  %p476_p3 = scmp.lt.u32.totalorder %s472_s22, %s640_s3 }
  0x27   :  { %p478_p4 = pnand %p476_p3, %p473_p2 }
  0x29   :  { %481 = shalt.err (!%p478_p4)
}
  0x2a   :  { %s482_s27 = scalar_lea.vmem %s43_s10, 2048  ;;  %p487_p6 = scmp.lt.s32.totalorder %s43_s10, %s43_s10 }
  0x2b   :  { %p483_p5 = scmp.ne.s32.totalorder %s43_s10, %s482_s27  ;;  %p488_p7 = scmp.lt.s32.totalorder %s482_s27, %s482_s27 }
  0x2d   :  { %p489_p8 = por %p488_p7, %p487_p6 }
  0x2f   :  { %p490_p9 = pnand %p489_p8, %p483_p5 }
  0x31   :  { %493 = shalt.err (!%p490_p9)
}
  0x32   :  { %48 = dma.hbm_to_vmem [thread:$0]  %s640_s3, 2048, %s43_s10, [#allocation6], %s523_s28, %s523_s28, %s524_s29  }
  0x33   :  { %516 = dma.done.wait [#allocation3], 128  }
  0x34   :  { %517 = vsyncadd [#allocation3], 4294967168 }
  0x35   :  { %518 = dma.done.wait [#allocation6], 4096  }
  0x36   :  { %519 = vsyncadd [#allocation6], 4294963200  ;;  %v527_v0 = vmov 0.0|0.0   ;;  %vm528_vm0 = vmmov 0   ;;  %v529_v1 = vmov 0.0   ;;  %v61_v2 = vld [vmem:[#allocation5] sm:$0xff] }
  0x37   :  { %371 = vmatprep.subr.bf16.mxu0 %v527_v0  ;;  %333 = vmatprep.mubr.msk.f32.mxu0 %vm528_vm0, %v529_v1  ;;  %v62_v3 = vld [vmem:[#allocation5 + $0x8] sm:$0xff]  ;;  %v63_v4 = vld [vmem:[#allocation5 + $0x10] sm:$0xff]  ;;  %v64_v6 = vld [vmem:[#allocation5 + $0x18] sm:$0xff]  ;;  %s530_s7 = smov [#allocation8]  }
  0x38   :  { %395 = vmatprep.subr.bf16.mxu1 %v527_v0  ;;  %368 = vmatprep.mubr.msk.f32.mxu1 %vm528_vm0, %v529_v1  ;;  %v372_v5 = vpack.c.bf16 %v62_v3, %v61_v2  ;;  %v375_v7 = vpack.c.bf16 %v64_v6, %v63_v4  ;;  %v65_v8 = vld [vmem:[#allocation5 + $0x20] sm:$0xff]  ;;  %v66_v9 = vld [vmem:[#allocation5 + $0x28] sm:$0xff]  ;;  %v157_v12 = vld [vmem:[#allocation7 + $0x10] sm:$0xff]  ;;  %s255_s8 = sshll.u32 %s530_s7, 4  ;;  %s256_s8 = int_to_ptr.vmem [resolvable:$true] %s255_s8 }
  0x39   :  { %v155_v10 = vld [vmem:[#allocation7] sm:$0xff]  ;;  %v156_v11 = vld [vmem:[#allocation7 + $0x8] sm:$0xff]  ;;  %v158_v13 = vld [vmem:[#allocation7 + $0x18] sm:$0xff]  ;;  %v378_v14 = vpack.c.bf16 %v66_v9, %v65_v8  ;;  %s494_s9 = scalar_lea.vmem %s256_s8, 128  ;;  %p499_p11 = scmp.lt.s32.totalorder %s256_s8, %s256_s8 }
  0x3a   :  { %373 = vmatpush3.bf16.msra.mxu0 %v372_v5  ;;  %v396_v15 = vpack.c.bf16 %v156_v11, %v155_v10  ;;  %v67_v16 = vld [vmem:[#allocation5 + $0x30] sm:$0xff]  ;;  %v68_v17 = vld [vmem:[#allocation5 + $0x38] sm:$0xff]  ;;  %v399_v18 = vpack.c.bf16 %v158_v13, %v157_v12  ;;  %v159_v19 = vld [vmem:[#allocation7 + $0x20] sm:$0xff]  ;;  %p495_p10 = scmp.ne.s32.totalorder %s256_s8, %s494_s9  ;;  %p500_p12 = scmp.lt.s32.totalorder %s494_s9, %s494_s9 }
  0x3b   :  { %374 = vmatprep.subr.bf16.mxu0 %v527_v0  ;;  %v160_v20 = vld [vmem:[#allocation7 + $0x28] sm:$0xff]  ;;  %v381_v21 = vpack.c.bf16 %v68_v17, %v67_v16  ;;  %v69_v22 = vld [vmem:[#allocation5 + $0x40] sm:$0xff]  ;;  %v161_v25 = vld [vmem:[#allocation7 + $0x30] sm:$0xff] }
  0x3c   :  { %397 = vmatpush3.bf16.msra.mxu1 %v396_v15  ;;  %v70_v23 = vld [vmem:[#allocation5 + $0x48] sm:$0xff]  ;;  %v402_v24 = vpack.c.bf16 %v160_v20, %v159_v19  ;;  %v162_v26 = vld [vmem:[#allocation7 + $0x38] sm:$0xff]  ;;  %v71_v28 = vld [vmem:[#allocation5 + $0x50] sm:$0xff]  ;;  %p501_p13 = por %p500_p12, %p499_p11 }
  0x3d   :  { %398 = vmatprep.subr.bf16.mxu1 %v527_v0  ;;  %v384_v27 = vpack.c.bf16 %v70_v23, %v69_v22  ;;  %v72_v29 = vld [vmem:[#allocation5 + $0x58] sm:$0xff]  ;;  %v405_v30 = vpack.c.bf16 %v162_v26, %v161_v25  ;;  %v163_v31 = vld [vmem:[#allocation7 + $0x40] sm:$0xff]  ;;  %v164_v32 = vld [vmem:[#allocation7 + $0x48] sm:$0xff] }
  0x3e   :  { %376 = vmatpush3.bf16.msra.mxu0 %v375_v7  ;;  %v387_v33 = vpack.c.bf16 %v72_v29, %v71_v28  ;;  %v73_v34 = vld [vmem:[#allocation5 + $0x60] sm:$0xff]  ;;  %v74_v35 = vld [vmem:[#allocation5 + $0x68] sm:$0xff]  ;;  %v408_v36 = vpack.c.bf16 %v164_v32, %v163_v31  ;;  %v165_v37 = vld [vmem:[#allocation7 + $0x50] sm:$0xff]  ;;  %p502_p0 = pnand %p501_p13, %p495_p10 }
  0x3f   :  { %377 = vmatprep.subr.bf16.mxu0 %v527_v0  ;;  %v166_v38 = vld [vmem:[#allocation7 + $0x58] sm:$0xff]  ;;  %v390_v39 = vpack.c.bf16 %v74_v35, %v73_v34  ;;  %v75_v40 = vld [vmem:[#allocation5 + $0x70] sm:$0xff]  ;;  %v167_v43 = vld [vmem:[#allocation7 + $0x60] sm:$0xff] }
  0x40   :  { %400 = vmatpush3.bf16.msra.mxu1 %v399_v18  ;;  %v76_v41 = vld [vmem:[#allocation5 + $0x78] sm:$0xff]  ;;  %v411_v42 = vpack.c.bf16 %v166_v38, %v165_v37  ;;  %v168_v44 = vld [vmem:[#allocation7 + $0x68] sm:$0xff]  ;;  %v169_v48 = vld [vmem:[#allocation7 + $0x70] sm:$0xff] }
  0x41   :  { %401 = vmatprep.subr.bf16.mxu1 %v527_v0  ;;  %v393_v45 = vpack.c.bf16 %v76_v41, %v75_v40  ;;  %v414_v46 = vpack.c.bf16 %v168_v44, %v167_v43  ;;  %v60_v47 = vld [vmem:[#allocation2] sm:$0xff] }
  0x42   :  { %379 = vmatpush3.bf16.msra.mxu0 %v378_v14  ;;  %v170_v49 = vld [vmem:[#allocation7 + $0x78] sm:$0xff] }
  0x43   :  { %380 = vmatprep.subr.bf16.mxu0 %v527_v0  ;;  %v417_v50 = vpack.c.bf16 %v170_v49, %v169_v48  ;;  %v265_v51 = vld [vmem:[%s639_s2] ss:$0 sm:$0xff] }
  0x44   :  { %403 = vmatpush3.bf16.msra.mxu1 %v402_v24  ;;  %v266_v56 = vld [vmem:[%s641_s4] ss:$0 sm:$0xff] }
  0x45   :  { %404 = vmatprep.subr.bf16.mxu1 %v527_v0 }
  0x46   :  { %382 = vmatpush3.bf16.msra.mxu0 %v381_v21 }
  0x47   :  { %383 = vmatprep.subr.bf16.mxu0 %v527_v0 }
  0x48   :  { %406 = vmatpush3.bf16.msra.mxu1 %v405_v30 }
  0x49   :  { %407 = vmatprep.subr.bf16.mxu1 %v527_v0 }
  0x4a   :  { %385 = vmatpush3.bf16.msra.mxu0 %v384_v27 }
  0x4b   :  { %386 = vmatprep.subr.bf16.mxu0 %v527_v0 }
  0x4c   :  { %409 = vmatpush3.bf16.msra.mxu1 %v408_v36 }
  0x4d   :  { %410 = vmatprep.subr.bf16.mxu1 %v527_v0 }
  0x4e   :  { %388 = vmatpush3.bf16.msra.mxu0 %v387_v33 }
  0x4f   :  { %389 = vmatprep.subr.bf16.mxu0 %v527_v0 }
  0x50   :  { %412 = vmatpush3.bf16.msra.mxu1 %v411_v42 }
  0x51   :  { %413 = vmatprep.subr.bf16.mxu1 %v527_v0 }
  0x52   :  { %391 = vmatpush3.bf16.msra.mxu0 %v390_v39 }
  0x53   :  { %392 = vmatprep.subr.bf16.mxu0 %v527_v0 }
  0x54   :  { %415 = vmatpush3.bf16.msra.mxu1 %v414_v46 }
  0x55   :  { %416 = vmatprep.subr.bf16.mxu1 %v527_v0 }
  0x56   :  { %394 = vmatpush3.bf16.msra.mxu0 %v393_v45 }
  0x58   :  { %418 = vmatpush3.bf16.msra.mxu1 %v417_v50 }
  0x59   :  { %334 = vmatmul.mubr.f32.vlgmr.msra.gmra.mrb[0].mxu0 %v60_v47 }
 0x12c   :  { %v150_v52 = vpop.f32.mrb[0].mxu0 }
 0x12d   :  { %v151_v53 = vadd.f32 %v265_v51, %v150_v52  ;;  %v335_v54 = vpop.f32.mrb[1].mxu0 }
 0x12f   :  { %v154_v55 = vmax.f32 %v151_v53, 0.0 }
 0x131   :  { %369 = vmatmul.mubr.f32.vlgmr.msra.gmra.mrb[0].mxu1 %v154_v55 }
 0x204   :  { %v244_v57 = vpop.f32.mrb[0].mxu1 }
 0x205   :  { %v245_v58 = vadd.f32 %v266_v56, %v244_v57  ;;  %v370_v59 = vpop.f32.mrb[1].mxu1 }
 0x207   :  { %248 = vst [vmem:[#allocation8] sm:$0xff] %v245_v58 }
 0x208   :  { %505 = shalt.err (!%p502_p0)
}
 0x209   :  { %s506_s11 = scalar_lea.hbm %s642_s5, 128 }
 0x20a   :  { %p507_p1 = scmp.ne.s32.totalorder %s642_s5, %s506_s11  ;;  %p510_p2 = scmp.lt.u32.totalorder %s506_s11, %s642_s5 }
 0x20c   :  { %p512_p3 = pnand %p510_p2, %p507_p1 }
 0x20e   :  { %515 = shalt.err (!%p512_p3)
}
 0x20f   :  { %258 = dma.vmem_to_hbm [thread:$0]  %s256_s8, 128, %s642_s5, [#allocation4]  }
 0x210   :  { %520 = dma.done.wait [#allocation4], 128  }
 0x211   :  { %521 = vsyncadd [#allocation4], 4294967168 }
 0x212   :  { %262 = vsyncpa [#allocation3], 1 }
 0x213   :  { %263 = vsyncpa [#allocation6], 1 }
 0x214   :  { %264 = vsyncpa [#allocation4], 1 }

</bundles_post_ra>
